<compile_context>
chip_gen: v7x
topology: tpu7x:2x2x1
jax: 0.10.0
libtpu: 0.0.40
codegen_flags: <defaults>
</compile_context>

<pallas_src>
import numpy as np
import jax
import jax.numpy as jnp
from jax.experimental import pallas as pl
from jax.experimental.pallas import tpu as pltpu


def _shift_lanes(x, d):
    """y[:, l] = x[:, l + d], zero where l + d falls outside [0, L) (Conv1d zero pad)."""
    C, L = x.shape
    if d == 0:
        return x
    z = jnp.zeros((C, abs(d)), x.dtype)
    if d > 0:
        return jnp.concatenate([x[:, d:], z], axis=1)
    return jnp.concatenate([z, x[:, :L + d]], axis=1)


def _fused_conv_bn_relu_kernel(x_ref, wbig_ref, bbig_ref, gamma_ref, beta_ref, out_ref):
    # x_ref:     (N, C, L)      f32
    # wbig_ref:  (Cm, 5*C)      f32  fused conv3/conv5/reduce weights (Cm = 2*Cout)
    # bbig_ref:  (Cm, 1)        f32  fused biases (b3+br ; b5+br)
    # gamma/beta:(Cm, 1)        f32  BatchNorm affine params
    # out_ref:   (N, Cm, L)
    N, C, L = x_ref.shape
    Cm = out_ref.shape[1]

    wbig = wbig_ref[...].astype(jnp.bfloat16)          # MXU operand (bf16, f32 accum)
    bbig = bbig_ref[...]                               # (Cm, 1) f32

    ys = []
    ssum = jnp.zeros((Cm, 1), jnp.float32)
    ssq = jnp.zeros((Cm, 1), jnp.float32)
    for b in range(N):                                 # N small & static -> unrolled
        x = x_ref[b]                                   # (C, L) f32
        # im2col stack: slot s holds x shifted by d = s - 2 (matches W_big layout).
        taps = [_shift_lanes(x, d) for d in (-2, -1, 0, 1, 2)]
        stack = jnp.concatenate(taps, axis=0).astype(jnp.bfloat16)   # (5*C, L)
        # One MXU push = conv3 + conv5 + reduce shortcut + channel concat + biases.
        y = jnp.dot(wbig, stack, preferred_element_type=jnp.float32) + bbig  # (Cm, L)
        ys.append(y)
        ssum = ssum + jnp.sum(y, axis=1, keepdims=True)
        ssq = ssq + jnp.sum(y * y, axis=1, keepdims=True)

    # BatchNorm1d, training mode: biased batch statistics over (batch, length).
    count = float(N * L)
    mean = ssum / count
    var = ssq / count - mean * mean
    inv = jax.lax.rsqrt(var + 1e-5)
    scale = gamma_ref[...] * inv                       # (Cm, 1)
    shift = beta_ref[...] - mean * scale               # (Cm, 1)
    for b in range(N):
        out_ref[b] = jnp.maximum(ys[b] * scale + shift, 0.0).astype(out_ref.dtype)


def _build_fused_params(params):
    """Fold conv3 / conv5 / reduce conv weights + biases into one matmul weight/bias."""
    w3, w5, wr = params["w3"], params["w5"], params["wr"]   # (Cout,C,3),(Cout,C,5),(Cout,C,1)
    cout, c, _ = w3.shape
    wr0 = wr[:, :, 0]                                        # (Cout, C)
    w_top = jnp.zeros((cout, 5, c), jnp.float32)
    w_top = w_top.at[:, 1:4, :].set(jnp.transpose(w3, (0, 2, 1)))   # conv3 taps -> slots 1..3
    w_top = w_top.at[:, 2, :].add(wr0)                               # reduce conv -> slot 2
    w_bot = jnp.transpose(w5, (0, 2, 1))                             # conv5 taps -> slots 0..4
    w_bot = w_bot.at[:, 2, :].add(wr0)
    w_big = jnp.concatenate([w_top.reshape(cout, 5 * c),
                             w_bot.reshape(cout, 5 * c)], axis=0)    # (2*Cout, 5*C)
    b_big = jnp.concatenate([params["b3"] + params["br"],
                             params["b5"] + params["br"]]).reshape(2 * cout, 1)
    return w_big, b_big


def res_multi_conv_1d_down(x, params):
    """x: (N, C, L) float32 (L ideally a multiple of 128). Returns (N, C//2, L) float32."""
    N, C, L = x.shape
    Cm = C // 2
    w_big, b_big = _build_fused_params(params)
    gamma = params["gamma"].reshape(Cm, 1)
    beta = params["beta"].reshape(Cm, 1)

    # TODO(synk): for production sizes (large N or L) tile L across a grid axis
    # (lane-dense 512+ blocks, marked "parallel") and switch BN to a two-pass tiled
    # reduction so the whole tensor never has to fit in VMEM (v7x has only 64 MiB).
    # At the small sizes here one fused block is fastest (no per-step overhead,
    # no second launch, no HBM round trip).
    return pl.pallas_call(
        _fused_conv_bn_relu_kernel,
        out_shape=jax.ShapeDtypeStruct((N, Cm, L), x.dtype),
        grid=(1,),
        in_specs=[
            pl.BlockSpec((N, C, L), lambda i: (0, 0, 0)),
            pl.BlockSpec((Cm, 5 * C), lambda i: (0, 0)),
            pl.BlockSpec((Cm, 1), lambda i: (0, 0)),
            pl.BlockSpec((Cm, 1), lambda i: (0, 0)),
            pl.BlockSpec((Cm, 1), lambda i: (0, 0)),
        ],
        out_specs=pl.BlockSpec((N, Cm, L), lambda i: (0, 0, 0)),
    )(x, w_big, b_big, gamma, beta)


def ref_forward(x, params):
    """Pure-JAX f32 reference mirroring the PyTorch forward (BN in training mode)."""
    def conv1d(x, w, b, pad):
        y = jax.lax.conv_general_dilated(
            x, w, window_strides=(1,), padding=[(pad, pad)],
            dimension_numbers=("NCH", "OIH", "NCH"))
        return y + b[None, :, None]

    xr = conv1d(x, params["wr"], params["br"], 0)
    x3 = conv1d(x, params["w3"], params["b3"], 1) + xr
    x5 = conv1d(x, params["w5"], params["b5"], 2) + xr
    y = jnp.concatenate([x3, x5], axis=1)
    mean = jnp.mean(y, axis=(0, 2), keepdims=True)
    var = jnp.mean((y - mean) ** 2, axis=(0, 2), keepdims=True)
    yn = (y - mean) / jnp.sqrt(var + 1e-5)
    yn = yn * params["gamma"][None, :, None] + params["beta"][None, :, None]
    return jnp.maximum(yn, 0.0)


def make_params(key, channels):
    cout = channels // 4
    cm = channels // 2
    ks = jax.random.split(key, 6)
    scale = 0.1
    return {
        "w3": jax.random.normal(ks[0], (cout, channels, 3), jnp.float32) * scale,
        "b3": jax.random.normal(ks[1], (cout,), jnp.float32) * scale,
        "w5": jax.random.normal(ks[2], (cout, channels, 5), jnp.float32) * scale,
        "b5": jax.random.normal(ks[3], (cout,), jnp.float32) * scale,
        "wr": jax.random.normal(ks[4], (cout, channels, 1), jnp.float32) * scale,
        "br": jax.random.normal(ks[5], (cout,), jnp.float32) * scale,
        # PyTorch BatchNorm1d default affine init: weight=1, bias=0
        "gamma": jnp.ones((cm,), jnp.float32),
        "beta": jnp.zeros((cm,), jnp.float32),
    }


if __name__ == "__main__":
    key = jax.random.PRNGKey(0)
    k_x, k_p = jax.random.split(key)

    N, C, L = 2, 16, 128          # batch, channels (module default 16), length
    x = jax.random.normal(k_x, (N, C, L), jnp.float32)
    params = make_params(k_p, C)

    out = jax.block_until_ready(res_multi_conv_1d_down(x, params))
    ref = jax.block_until_ready(ref_forward(x, params))

    assert out.shape == (N, C // 2, L)
    # Tolerance accounts for bf16 MXU operands (f32 accumulation) vs. the f32 reference.
    np.testing.assert_allclose(np.asarray(out), np.asarray(ref), atol=3e-2, rtol=3e-2)
    print("KERNEL_OK")
</pallas_src>

<mosaic_0001>
module attributes {stable_mosaic.version = 11 : i64} {
  func.func @_fused_conv_bn_relu_kernel(%arg0: i32, %arg1: memref<2x16x128xf32, #tpu.memory_space<vmem>>, %arg2: memref<8x80xf32, #tpu.memory_space<vmem>>, %arg3: memref<8x1xf32, #tpu.memory_space<vmem>>, %arg4: memref<8x1xf32, #tpu.memory_space<vmem>>, %arg5: memref<8x1xf32, #tpu.memory_space<vmem>>, %arg6: memref<2x8x128xf32, #tpu.memory_space<vmem>>) attributes {dimension_semantics = [#tpu.dimension_semantics<arbitrary>], iteration_bounds = array<i64: 1>, scalar_prefetch = 0 : i64, scratch_operands = 0 : i64, tpu.core_type = #tpu.core_type<tc>, window_params = [{pipeline_mode = #tpu.pipeline_mode<synchronous>, transform_indices = @transform_0, window_bounds = array<i64: 2, 16, 128>}, {pipeline_mode = #tpu.pipeline_mode<synchronous>, transform_indices = @transform_1, window_bounds = array<i64: 8, 80>}, {pipeline_mode = #tpu.pipeline_mode<synchronous>, transform_indices = @transform_2, window_bounds = array<i64: 8, 1>}, {pipeline_mode = #tpu.pipeline_mode<synchronous>, transform_indices = @transform_3, window_bounds = array<i64: 8, 1>}, {pipeline_mode = #tpu.pipeline_mode<synchronous>, transform_indices = @transform_4, window_bounds = array<i64: 8, 1>}, {pipeline_mode = #tpu.pipeline_mode<synchronous>, transform_indices = @transform_5, window_bounds = array<i64: 2, 8, 128>}]} {
    %c0 = arith.constant 0 : index
    %c0_0 = arith.constant 0 : index
    %0 = vector.load %arg2[%c0, %c0_0] : memref<8x80xf32, #tpu.memory_space<vmem>>, vector<8x80xf32>
    %1 = arith.truncf %0 : vector<8x80xf32> to vector<8x80xbf16>
    %c0_1 = arith.constant 0 : index
    %c0_2 = arith.constant 0 : index
    %2 = vector.load %arg3[%c0_1, %c0_2] : memref<8x1xf32, #tpu.memory_space<vmem>>, vector<8x1xf32>
    %cst = arith.constant 0.000000e+00 : f32
    %3 = vector.broadcast %cst : f32 to vector<8x1xf32>
    %cst_3 = arith.constant 0.000000e+00 : f32
    %4 = vector.broadcast %cst_3 : f32 to vector<8x1xf32>
    %c0_4 = arith.constant 0 : index
    %c0_5 = arith.constant 0 : index
    %c0_6 = arith.constant 0 : index
    %5 = vector.load %arg1[%c0_4, %c0_5, %c0_6] : memref<2x16x128xf32, #tpu.memory_space<vmem>>, vector<1x16x128xf32>
    %6 = vector.shape_cast %5 : vector<1x16x128xf32> to vector<16x128xf32>
    %cst_7 = arith.constant 0.000000e+00 : f32
    %7 = vector.broadcast %cst_7 : f32 to vector<16x2xf32>
    %8 = vector.extract_strided_slice %6 {offsets = [0, 0], sizes = [16, 126], strides = [1, 1]} : vector<16x128xf32> to vector<16x126xf32>
    %9 = tpu.concatenate %7, %8 in 1 : vector<16x2xf32>, vector<16x126xf32> -> vector<16x128xf32>
    %cst_8 = arith.constant 0.000000e+00 : f32
    %10 = vector.broadcast %cst_8 : f32 to vector<16x1xf32>
    %11 = vector.extract_strided_slice %6 {offsets = [0, 0], sizes = [16, 127], strides = [1, 1]} : vector<16x128xf32> to vector<16x127xf32>
    %12 = tpu.concatenate %10, %11 in 1 : vector<16x1xf32>, vector<16x127xf32> -> vector<16x128xf32>
    %cst_9 = arith.constant 0.000000e+00 : f32
    %13 = vector.broadcast %cst_9 : f32 to vector<16x1xf32>
    %14 = vector.extract_strided_slice %6 {offsets = [0, 1], sizes = [16, 127], strides = [1, 1]} : vector<16x128xf32> to vector<16x127xf32>
    %15 = tpu.concatenate %14, %13 in 1 : vector<16x127xf32>, vector<16x1xf32> -> vector<16x128xf32>
    %cst_10 = arith.constant 0.000000e+00 : f32
    %16 = vector.broadcast %cst_10 : f32 to vector<16x2xf32>
    %17 = vector.extract_strided_slice %6 {offsets = [0, 2], sizes = [16, 126], strides = [1, 1]} : vector<16x128xf32> to vector<16x126xf32>
    %18 = tpu.concatenate %17, %16 in 1 : vector<16x126xf32>, vector<16x2xf32> -> vector<16x128xf32>
    %19 = tpu.concatenate %9, %12, %6, %15, %18 in 0 : vector<16x128xf32>, vector<16x128xf32>, vector<16x128xf32>, vector<16x128xf32>, vector<16x128xf32> -> vector<80x128xf32>
    %20 = arith.truncf %19 : vector<80x128xf32> to vector<80x128xbf16>
    %cst_11 = arith.constant dense<0.000000e+00> : vector<8x128xf32>
    %21 = tpu.matmul %1, %20, %cst_11 {dimension_numbers = #tpu.dot_dimension_numbers<[1], [0], [0], [1], [0, 0, 1, 1], [], []>} : vector<8x80xbf16>, vector<80x128xbf16>, vector<8x128xf32> -> vector<8x128xf32>
    %22 = vector.broadcast %2 : vector<8x1xf32> to vector<8x128xf32>
    %23 = arith.addf %21, %22 : vector<8x128xf32>
    %cst_12 = arith.constant dense<0.000000e+00> : vector<8xf32>
    %24 = vector.multi_reduction <add>, %23, %cst_12 [1] : vector<8x128xf32> to vector<8xf32>
    %25 = vector.shape_cast %24 : vector<8xf32> to vector<8x1xf32>
    %26 = arith.addf %3, %25 : vector<8x1xf32>
    %27 = arith.mulf %23, %23 : vector<8x128xf32>
    %cst_13 = arith.constant dense<0.000000e+00> : vector<8xf32>
    %28 = vector.multi_reduction <add>, %27, %cst_13 [1] : vector<8x128xf32> to vector<8xf32>
    %29 = vector.shape_cast %28 : vector<8xf32> to vector<8x1xf32>
    %30 = arith.addf %4, %29 : vector<8x1xf32>
    %c1 = arith.constant 1 : index
    %c0_14 = arith.constant 0 : index
    %c0_15 = arith.constant 0 : index
    %31 = vector.load %arg1[%c1, %c0_14, %c0_15] : memref<2x16x128xf32, #tpu.memory_space<vmem>>, vector<1x16x128xf32>
    %32 = vector.shape_cast %31 : vector<1x16x128xf32> to vector<16x128xf32>
    %cst_16 = arith.constant 0.000000e+00 : f32
    %33 = vector.broadcast %cst_16 : f32 to vector<16x2xf32>
    %34 = vector.extract_strided_slice %32 {offsets = [0, 0], sizes = [16, 126], strides = [1, 1]} : vector<16x128xf32> to vector<16x126xf32>
    %35 = tpu.concatenate %33, %34 in 1 : vector<16x2xf32>, vector<16x126xf32> -> vector<16x128xf32>
    %cst_17 = arith.constant 0.000000e+00 : f32
    %36 = vector.broadcast %cst_17 : f32 to vector<16x1xf32>
    %37 = vector.extract_strided_slice %32 {offsets = [0, 0], sizes = [16, 127], strides = [1, 1]} : vector<16x128xf32> to vector<16x127xf32>
    %38 = tpu.concatenate %36, %37 in 1 : vector<16x1xf32>, vector<16x127xf32> -> vector<16x128xf32>
    %cst_18 = arith.constant 0.000000e+00 : f32
    %39 = vector.broadcast %cst_18 : f32 to vector<16x1xf32>
    %40 = vector.extract_strided_slice %32 {offsets = [0, 1], sizes = [16, 127], strides = [1, 1]} : vector<16x128xf32> to vector<16x127xf32>
    %41 = tpu.concatenate %40, %39 in 1 : vector<16x127xf32>, vector<16x1xf32> -> vector<16x128xf32>
    %cst_19 = arith.constant 0.000000e+00 : f32
    %42 = vector.broadcast %cst_19 : f32 to vector<16x2xf32>
    %43 = vector.extract_strided_slice %32 {offsets = [0, 2], sizes = [16, 126], strides = [1, 1]} : vector<16x128xf32> to vector<16x126xf32>
    %44 = tpu.concatenate %43, %42 in 1 : vector<16x126xf32>, vector<16x2xf32> -> vector<16x128xf32>
    %45 = tpu.concatenate %35, %38, %32, %41, %44 in 0 : vector<16x128xf32>, vector<16x128xf32>, vector<16x128xf32>, vector<16x128xf32>, vector<16x128xf32> -> vector<80x128xf32>
    %46 = arith.truncf %45 : vector<80x128xf32> to vector<80x128xbf16>
    %cst_20 = arith.constant dense<0.000000e+00> : vector<8x128xf32>
    %47 = tpu.matmul %1, %46, %cst_20 {dimension_numbers = #tpu.dot_dimension_numbers<[1], [0], [0], [1], [0, 0, 1, 1], [], []>} : vector<8x80xbf16>, vector<80x128xbf16>, vector<8x128xf32> -> vector<8x128xf32>
    %48 = vector.broadcast %2 : vector<8x1xf32> to vector<8x128xf32>
    %49 = arith.addf %47, %48 : vector<8x128xf32>
    %cst_21 = arith.constant dense<0.000000e+00> : vector<8xf32>
    %50 = vector.multi_reduction <add>, %49, %cst_21 [1] : vector<8x128xf32> to vector<8xf32>
    %51 = vector.shape_cast %50 : vector<8xf32> to vector<8x1xf32>
    %52 = arith.addf %26, %51 : vector<8x1xf32>
    %53 = arith.mulf %49, %49 : vector<8x128xf32>
    %cst_22 = arith.constant dense<0.000000e+00> : vector<8xf32>
    %54 = vector.multi_reduction <add>, %53, %cst_22 [1] : vector<8x128xf32> to vector<8xf32>
    %55 = vector.shape_cast %54 : vector<8xf32> to vector<8x1xf32>
    %56 = arith.addf %30, %55 : vector<8x1xf32>
    %cst_23 = arith.constant 2.560000e+02 : f32
    %57 = vector.broadcast %cst_23 : f32 to vector<8x1xf32>
    %58 = arith.divf %52, %57 : vector<8x1xf32>
    %cst_24 = arith.constant 2.560000e+02 : f32
    %59 = vector.broadcast %cst_24 : f32 to vector<8x1xf32>
    %60 = arith.divf %56, %59 : vector<8x1xf32>
    %61 = arith.mulf %58, %58 : vector<8x1xf32>
    %62 = arith.subf %60, %61 : vector<8x1xf32>
    %cst_25 = arith.constant 9.99999974E-6 : f32
    %63 = vector.broadcast %cst_25 : f32 to vector<8x1xf32>
    %64 = arith.addf %62, %63 : vector<8x1xf32>
    %65 = math.rsqrt %64 : vector<8x1xf32>
    %c0_26 = arith.constant 0 : index
    %c0_27 = arith.constant 0 : index
    %66 = vector.load %arg4[%c0_26, %c0_27] : memref<8x1xf32, #tpu.memory_space<vmem>>, vector<8x1xf32>
    %67 = arith.mulf %66, %65 : vector<8x1xf32>
    %c0_28 = arith.constant 0 : index
    %c0_29 = arith.constant 0 : index
    %68 = vector.load %arg5[%c0_28, %c0_29] : memref<8x1xf32, #tpu.memory_space<vmem>>, vector<8x1xf32>
    %69 = arith.mulf %58, %67 : vector<8x1xf32>
    %70 = arith.subf %68, %69 : vector<8x1xf32>
    %71 = vector.broadcast %67 : vector<8x1xf32> to vector<8x128xf32>
    %72 = arith.mulf %23, %71 : vector<8x128xf32>
    %73 = vector.broadcast %70 : vector<8x1xf32> to vector<8x128xf32>
    %74 = arith.addf %72, %73 : vector<8x128xf32>
    %cst_30 = arith.constant 0.000000e+00 : f32
    %75 = vector.broadcast %cst_30 : f32 to vector<8x128xf32>
    %76 = arith.maximumf %74, %75 : vector<8x128xf32>
    %c0_31 = arith.constant 0 : index
    %c0_32 = arith.constant 0 : index
    %c0_33 = arith.constant 0 : index
    %77 = vector.load %arg6[%c0_31, %c0_32, %c0_33] : memref<2x8x128xf32, #tpu.memory_space<vmem>>, vector<1x8x128xf32>
    %78 = vector.shape_cast %77 : vector<1x8x128xf32> to vector<8x128xf32>
    %79 = vector.shape_cast %76 : vector<8x128xf32> to vector<1x8x128xf32>
    tpu.vector_store %arg6[%c0_31, %c0_32, %c0_33], %79 {strides = array<i32>} : memref<2x8x128xf32, #tpu.memory_space<vmem>>, vector<1x8x128xf32>,
    %80 = vector.broadcast %67 : vector<8x1xf32> to vector<8x128xf32>
    %81 = arith.mulf %49, %80 : vector<8x128xf32>
    %82 = vector.broadcast %70 : vector<8x1xf32> to vector<8x128xf32>
    %83 = arith.addf %81, %82 : vector<8x128xf32>
    %cst_34 = arith.constant 0.000000e+00 : f32
    %84 = vector.broadcast %cst_34 : f32 to vector<8x128xf32>
    %85 = arith.maximumf %83, %84 : vector<8x128xf32>
    %c1_35 = arith.constant 1 : index
    %c0_36 = arith.constant 0 : index
    %c0_37 = arith.constant 0 : index
    %86 = vector.load %arg6[%c1_35, %c0_36, %c0_37] : memref<2x8x128xf32, #tpu.memory_space<vmem>>, vector<1x8x128xf32>
    %87 = vector.shape_cast %86 : vector<1x8x128xf32> to vector<8x128xf32>
    %88 = vector.shape_cast %85 : vector<8x128xf32> to vector<1x8x128xf32>
    tpu.vector_store %arg6[%c1_35, %c0_36, %c0_37], %88 {strides = array<i32>} : memref<2x8x128xf32, #tpu.memory_space<vmem>>, vector<1x8x128xf32>,
    return
  }
  func.func @transform_0(%arg0: i32) -> (i32, i32, i32) {
    %c0_i32 = arith.constant 0 : i32
    %c0_i32_0 = arith.constant 0 : i32
    %c0_i32_1 = arith.constant 0 : i32
    %c0_i32_2 = arith.constant 0 : i32
    return %c0_i32, %c0_i32_0, %c0_i32_1 : i32, i32, i32
  }
  func.func @transform_1(%arg0: i32) -> (i32, i32) {
    %c0_i32 = arith.constant 0 : i32
    %c0_i32_0 = arith.constant 0 : i32
    %c0_i32_1 = arith.constant 0 : i32
    return %c0_i32, %c0_i32_0 : i32, i32
  }
  func.func @transform_2(%arg0: i32) -> (i32, i32) {
    %c0_i32 = arith.constant 0 : i32
    %c0_i32_0 = arith.constant 0 : i32
    %c0_i32_1 = arith.constant 0 : i32
    return %c0_i32, %c0_i32_0 : i32, i32
  }
  func.func @transform_3(%arg0: i32) -> (i32, i32) {
    %c0_i32 = arith.constant 0 : i32
    %c0_i32_0 = arith.constant 0 : i32
    %c0_i32_1 = arith.constant 0 : i32
    return %c0_i32, %c0_i32_0 : i32, i32
  }
  func.func @transform_4(%arg0: i32) -> (i32, i32) {
    %c0_i32 = arith.constant 0 : i32
    %c0_i32_0 = arith.constant 0 : i32
    %c0_i32_1 = arith.constant 0 : i32
    return %c0_i32, %c0_i32_0 : i32, i32
  }
  func.func @transform_5(%arg0: i32) -> (i32, i32, i32) {
    %c0_i32 = arith.constant 0 : i32
    %c0_i32_0 = arith.constant 0 : i32
    %c0_i32_1 = arith.constant 0 : i32
    %c0_i32_2 = arith.constant 0 : i32
    return %c0_i32, %c0_i32_0, %c0_i32_1 : i32, i32, i32
  }
}

</mosaic_0001>

<bundles_post_ra>
// kernel: tpu_custom_call.1
= control target key start
LH: loop header
LB: loop body
LE: loop exit
PB: predicated region body
PF: predicated region fallthrough
CT: control target
= control target key end

     0   :  { %10 = vsyncpa [#allocation3], 0  ;;  %s592_s0 = inlined_call_operand.hbm [shape: f32[2,16,128], index: 0, kind: input, shape index: {}]   ;;  %s593_s1 = inlined_call_operand.vmem [shape: f32[8,80], index: 1, kind: input, shape index: {}]   ;;  %s594_s2 = inlined_call_operand.vmem [shape: f32[8,1], index: 2, kind: input, shape index: {}]   ;;  %s595_s3 = inlined_call_operand.vmem [shape: f32[8,1], index: 3, kind: input, shape index: {}]   ;;  %s596_s4 = inlined_call_operand.vmem [shape: f32[8,1], index: 4, kind: input, shape index: {}]   ;;  %s597_s5 = inlined_call_operand.hbm [shape: f32[2,8,128], index: 5, kind: output, shape index: {}]  }
   0x1   :  { %11 = vsyncpa [#allocation4], 0  ;;  %s454_s18 = smov [#allocation2]   ;;  %s406_s22 = scalar_lea.hbm %s592_s0, 512 }
   0x2   :  { %s17_s19 = sshll.u32 %s454_s18, 4  ;;  %p407_p0 = scmp.ne.s32.totalorder %s592_s0, %s406_s22  ;;  %s18_s19 = int_to_ptr.vmem [resolvable:$true] %s17_s19 }
   0x3   :  { %p410_p1 = scmp.lt.u32.totalorder %s406_s22, %s592_s0 }
   0x5   :  { %p412_p2 = pnand %p410_p1, %p407_p0 }
   0x7   :  { %415 = shalt.err (!%p412_p2)
}
   0x8   :  { %s416_s27 = scalar_lea.vmem %s18_s19, 512  ;;  %p421_p4 = scmp.lt.s32.totalorder %s18_s19, %s18_s19 }
   0x9   :  { %p417_p3 = scmp.ne.s32.totalorder %s18_s19, %s416_s27  ;;  %p422_p5 = scmp.lt.s32.totalorder %s416_s27, %s416_s27 }
   0xb   :  { %p423_p6 = por %p422_p5, %p421_p4 }
   0xd   :  { %p424_p7 = pnand %p423_p6, %p417_p3 }
   0xf   :  { %427 = shalt.err (!%p424_p7)
}
  0x10   :  { %s455_s28 = smov 128   ;;  %s456_s29 = smov 8  }
  0x11   :  { %23 = dma.hbm_to_vmem [thread:$0]  %s592_s0, 512, %s18_s19, [#allocation3], %s455_s28, %s455_s28, %s456_s29  }
  0x12   :  { %450 = dma.done.wait [#allocation3], 512  }
  0x13   :  { %451 = vsyncadd [#allocation3], 4294966784  ;;  %v457_v0 = vmov 0.0   ;;  %v512_v1 = vld [vmem:[#allocation2] sm:$0xff]  ;;  %v514_v2 = vld [vmem:[#allocation2 + $0x8] sm:$0xff]  ;;  %s458_s7 = smov 2  }
  0x14   :  { %323 = vmatprep.subr.bf16.mxu0 %v457_v0  ;;  %337 = vmatprep.subr.bf16.mxu1 %v457_v0  ;;  %v516_v3 = vld [vmem:[#allocation2 + $0x10] sm:$0xff]  ;;  %v362_v4 = vpack.i.bf16 %v514_v2, %v512_v1  ;;  %v520_v5 = vld [vmem:[#allocation2 + $0x18] sm:$0xff]  ;;  %s459_s0 = smov 1   ;;  %v81_v7 = vpack.c.bf16 %v514_v2, %v512_v1  ;;  %s460_s8 = smov 127   ;;  %vm461_vm0 = vmmov 0   ;;  %v38_v9 = vld [vmem:[%s594_s2] sm:$0xff] }
  0x15   :  { %v367_v6 = vpack.i.bf16 %v520_v5, %v516_v3  ;;  %v179_v8 = vpack.c.bf16 %v520_v5, %v516_v3  ;;  %333 = vmatprep.mubr.msk.bf16.mxu0 %vm461_vm0, %v457_v0  ;;  %347 = vmatprep.mubr.msk.bf16.mxu1 %vm461_vm0, %v457_v0  ;;  %s462_s9 = smov 126   ;;  %v463_v10 = vmov 0   ;;  %vm49_vm1 = vcmask 15360   ;;  %v36_v44 = vld [vmem:[%s593_s1] sm:$0xff]  ;;  %s464_s16 = smov [#allocation5]  }
  0x16   :  { %363 = vrot.lane.b32.xlu0 %v362_v4, %s458_s7  ;;  %373 = vrot.lane.b32.xlu1 %v362_v4, %s459_s0  ;;  %vm533_vm2 = vmneg %vm49_vm1  ;;  %vm58_vm3 = vcmask 7168   ;;  %vm67_vm7 = vcmask 1039360   ;;  %vm76_vm9 = vcmask 1031168   ;;  %v37_v45 = vpack.c.bf16 %v36_v44, %v36_v44  ;;  %s265_s17 = sshll.u32 %s464_s16, 4  ;;  %s266_s17 = int_to_ptr.vmem [resolvable:$true] %s265_s17 }
  0x17   :  { %402 = vset.pattern.permute.xlu0 %v463_v10  ;;  %403 = vset.pattern.permute.xlu1 %v463_v10  ;;  %vm279_vm4 = vmpackc.low %vm533_vm2, %vm533_vm2  ;;  %vm89_vm11 = vcmask 654336   ;;  %v238_v10 = vld [vmem:[%s596_s4] sm:$0xff]  ;;  %p433_p9 = scmp.lt.s32.totalorder %s266_s17, %s266_s17 }
  0x18   :  { %vm540_vm5 = vmneg %vm58_vm3 }
  0x19   :  { %vm284_vm6 = vmpackc.low %vm540_vm5, %vm540_vm5 }
  0x1a   :  { %368 = vrot.lane.b32.xlu0 %v367_v6, %s458_s7  ;;  %378 = vrot.lane.b32.xlu1 %v367_v6, %s459_s0  ;;  %vm287_vm8 = vmpackc.low %vm67_vm7, %vm67_vm7 }
  0x1b   :  { %vm290_vm10 = vmpackc.low %vm76_vm9, %vm76_vm9 }
  0x1e   :  { %383 = vrot.lane.b32.xlu0 %v362_v4, %s460_s8  ;;  %388 = vrot.lane.b32.xlu1 %v367_v6, %s460_s8 }
  0x22   :  { %393 = vrot.lane.b32.xlu0 %v362_v4, %s462_s9  ;;  %398 = vrot.lane.b32.xlu1 %v367_v6, %s462_s9 }
  0x26   :  { %86 = vperm.xlu0 %402, %v38_v9  }
  0x88   :  { %v364_v12 = vpop.permute.xlu0 %363  ;;  %v374_v13 = vpop.permute.xlu1 %373 }
  0x89   :  { %v366_v14 = vunpack.i.h.bf16 %v364_v12  ;;  %v365_v15 = vunpack.i.l.bf16 %v364_v12  ;;  %v376_v16 = vunpack.i.h.bf16 %v374_v13  ;;  %v375_v17 = vunpack.i.l.bf16 %v374_v13 }
  0x8b   :  { %v280_v18 = vpack.c.bf16 %v366_v14, %v365_v15  ;;  %v285_v20 = vpack.c.bf16 %v376_v16, %v375_v17 }
  0x8c   :  { %v369_v21 = vpop.permute.xlu0 %368  ;;  %v379_v22 = vpop.permute.xlu1 %378 }
  0x8d   :  { %v371_v23 = vunpack.i.h.bf16 %v369_v21  ;;  %v370_v24 = vunpack.i.l.bf16 %v369_v21  ;;  %324 = vmatpush3.bf16.msk.msra.mxu0 %vm279_vm4, %v280_v18  ;;  %v381_v25 = vunpack.i.h.bf16 %v379_v22  ;;  %v380_v26 = vunpack.i.l.bf16 %v379_v22 }
  0x8e   :  { %325 = vmatprep.subr.bf16.mxu0 %v457_v0 }
  0x8f   :  { %v297_v27 = vpack.c.bf16 %v371_v23, %v370_v24  ;;  %v302_v30 = vpack.c.bf16 %v381_v25, %v380_v26 }
  0x90   :  { %v384_v28 = vpop.permute.xlu0 %383  ;;  %v389_v29 = vpop.permute.xlu1 %388 }
  0x91   :  { %326 = vmatpush3.bf16.msk.msra.mxu0 %vm284_vm6, %v285_v20  ;;  %338 = vmatpush3.bf16.msk.msra.mxu1 %vm279_vm4, %v297_v27  ;;  %v386_v31 = vunpack.i.h.bf16 %v384_v28  ;;  %v385_v32 = vunpack.i.l.bf16 %v384_v28  ;;  %v391_v33 = vunpack.i.h.bf16 %v389_v29  ;;  %v390_v36 = vunpack.i.l.bf16 %v389_v29 }
  0x92   :  { %339 = vmatprep.subr.bf16.mxu1 %v457_v0  ;;  %327 = vmatprep.subr.bf16.mxu0 %v457_v0 }
  0x93   :  { %v288_v35 = vpack.c.bf16 %v386_v31, %v385_v32  ;;  %v305_v40 = vpack.c.bf16 %v391_v33, %v390_v36 }
  0x94   :  { %v394_v34 = vpop.permute.xlu0 %393  ;;  %v399_v39 = vpop.permute.xlu1 %398 }
  0x95   :  { %340 = vmatpush3.bf16.msk.msra.mxu1 %vm284_vm6, %v302_v30  ;;  %328 = vmatpush3.bf16.msra.mxu0 %v81_v7  ;;  %v396_v37 = vunpack.i.h.bf16 %v394_v34  ;;  %v395_v38 = vunpack.i.l.bf16 %v394_v34  ;;  %v401_v42 = vunpack.i.h.bf16 %v399_v39  ;;  %v400_v43 = vunpack.i.l.bf16 %v399_v39  ;;  %v236_v7 = vld [vmem:[%s595_s3] sm:$0xff]  ;;  %s428_s3 = scalar_lea.vmem %s266_s17, 256 }
  0x96   :  { %341 = vmatprep.subr.bf16.mxu1 %v457_v0  ;;  %329 = vmatprep.subr.bf16.mxu0 %v457_v0  ;;  %p429_p8 = scmp.ne.s32.totalorder %s266_s17, %s428_s3  ;;  %p434_p10 = scmp.lt.s32.totalorder %s428_s3, %s428_s3 }
  0x97   :  { %v291_v41 = vpack.c.bf16 %v396_v37, %v395_v38  ;;  %v308_v46 = vpack.c.bf16 %v401_v42, %v400_v43 }
  0x98   :  { %p435_p11 = por %p434_p10, %p433_p9 }
  0x99   :  { %342 = vmatpush3.bf16.msra.mxu1 %v179_v8  ;;  %330 = vmatpush3.bf16.msk.msra.mxu0 %vm287_vm8, %v288_v35 }
  0x9a   :  { %343 = vmatprep.subr.bf16.mxu1 %v457_v0  ;;  %331 = vmatprep.subr.bf16.mxu0 %v457_v0  ;;  %p436_p12 = pnand %p435_p11, %p429_p8 }
  0x9d   :  { %344 = vmatpush3.bf16.msk.msra.mxu1 %vm287_vm8, %v305_v40  ;;  %332 = vmatpush3.bf16.msk.msra.mxu0 %vm290_vm10, %v291_v41 }
  0x9e   :  { %345 = vmatprep.subr.bf16.mxu1 %v457_v0 }
  0xa0   :  { %334 = vmatmul.mubr.msk.bf16.vlgmr.msra.gmra.mrb[0].mxu0 %vm89_vm11, %v37_v45 }
  0xa1   :  { %346 = vmatpush3.bf16.msk.msra.mxu1 %vm290_vm10, %v308_v46 }
  0xa4   :  { %348 = vmatmul.mubr.msk.bf16.vlgmr.msra.gmra.mrb[0].mxu1 %vm89_vm11, %v37_v45 }
  0xa5   :  { %v87_v47 = vpop.permute.xlu0 %86 }
 0x173   :  { %v127_v48 = vpop.f32.mrb[0].mxu0 }
 0x174   :  { %v128_v49 = vadd.f32 %v127_v48, %v87_v47  ;;  %v335_v50 = vpop.f32.mrb[1].mxu0 }
 0x175   :  { %v130_v51 = vpop.f32.mrb[2].mxu0 }
 0x176   :  { %v336_v52 = vpop.f32.mrb[3].mxu0  ;;  %133 = vadd.xlane.f32.xlu1 %v128_v49  ;;  %v136_v53 = vmul.f32 %v128_v49, %v128_v49 }
 0x177   :  { %v216_v54 = vpop.f32.mrb[0].mxu1 }
 0x178   :  { %v217_v55 = vadd.f32 %v216_v54, %v87_v47  ;;  %v349_v56 = vpop.f32.mrb[1].mxu1 }
 0x179   :  { %v219_v57 = vpop.f32.mrb[2].mxu1 }
 0x17a   :  { %222 = vadd.xlane.f32.xlu0 %v217_v55  ;;  %v350_v58 = vpop.f32.mrb[3].mxu1  ;;  %137 = vadd.xlane.f32.xlu1 %v136_v53  ;;  %v225_v59 = vmul.f32 %v217_v55, %v217_v55 }
 0x17e   :  { %226 = vadd.xlane.f32.xlu0 %v225_v59 }
 0x203   :  { %v134_v60 = vpop.xlane.xlu1 %133 }
 0x207   :  { %v223_v61 = vpop.xlane.xlu0 %222  ;;  %v138_v0 = vpop.xlane.xlu1 %137 }
 0x208   :  { %v224_v62 = vadd.f32 %v223_v61, %v134_v60 }
 0x20a   :  { %v230_v63 = vmul.f32 0.00390625, %v224_v62 }
 0x20b   :  { %v227_v1 = vpop.xlane.xlu0 %226 }
 0x20c   :  { %v228_v2 = vadd.f32 %v227_v1, %v138_v0  ;;  %v232_v3 = vmul.f32 %v230_v63, %v230_v63 }
 0x20e   :  { %v231_v4 = vmul.f32 0.00390625, %v228_v2 }
 0x210   :  { %v233_v5 = vsub.f32 %v231_v4, %v232_v3 }
 0x212   :  { %v234_v6 = vadd.f32 1e-05, %v233_v5 }
 0x214   :  { %404 = vrsqrt.f32 %v234_v6 }
 0x21e   :  { %v405_v8 = vpop.eup %404 }
 0x21f   :  { %v237_v9 = vmul.f32 %v405_v8, %v236_v7 }
 0x221   :  { %243 = vperm.xlu1 %403, %v237_v9   ;;  %v239_v11 = vmul.f32 %v237_v9, %v230_v63 }
 0x223   :  { %v240_v12 = vsub.f32 %v238_v10, %v239_v11 }
 0x225   :  { %249 = vperm.xlu0 %402, %v240_v12  }
 0x2a0   :  { %v244_v13 = vpop.permute.xlu1 %243 }
 0x2a1   :  { %v246_v14 = vmul.f32 %v244_v13, %v128_v49  ;;  %v255_v15 = vmul.f32 %v244_v13, %v217_v55 }
 0x2a4   :  { %v250_v16 = vpop.permute.xlu0 %249 }
 0x2a5   :  { %v252_v17 = vadd.f32 %v250_v16, %v246_v14  ;;  %v256_v18 = vadd.f32 %v255_v15, %v250_v16 }
 0x2a7   :  { %v253_v19 = vmax.f32 %v252_v17, 0.0  ;;  %v257_v20 = vmax.f32 %v256_v18, 0.0 }
 0x2a9   :  { %254 = vst [vmem:[#allocation5] sm:$0xff] %v253_v19  ;;  %259 = vst [vmem:[#allocation5 + $0x8] sm:$0xff] %v257_v20 }
 0x2aa   :  { %439 = shalt.err (!%p436_p12)
}
 0x2ab   :  { %s440_s19 = scalar_lea.hbm %s597_s5, 256 }
 0x2ac   :  { %p441_p13 = scmp.ne.s32.totalorder %s597_s5, %s440_s19  ;;  %p444_p0 = scmp.lt.u32.totalorder %s440_s19, %s597_s5 }
 0x2ae   :  { %p446_p1 = pnand %p444_p0, %p441_p13 }
 0x2b0   :  { %449 = shalt.err (!%p446_p1)
}
 0x2b1   :  { %271 = dma.vmem_to_hbm [thread:$0]  %s266_s17, 256, %s597_s5, [#allocation4], %s455_s28, %s455_s28, %s456_s29  }
 0x2b2   :  { %452 = dma.done.wait [#allocation4], 256  }
 0x2b3   :  { %453 = vsyncadd [#allocation4], 4294967040 }
 0x2b4   :  { %275 = vsyncpa [#allocation3], 1 }
 0x2b5   :  { %276 = vsyncpa [#allocation4], 1 }

</bundles_post_ra>
